<compile_context>
chip_gen: v6e
topology: v6e:2x2x1
jax: 0.10.0
libtpu: 0.0.40
codegen_flags: <defaults>
</compile_context>

<pallas_src>
import math
import functools

import jax
import jax.numpy as jnp
from jax.experimental import pallas as pl
from jax.experimental.pallas import tpu as pltpu

# PReLU slopes (module defaults set via set_slopes()).
SLOPE_POSITIVE = 1.0
SLOPE_NEGATIVE = 0.25

_LANE = 128          # lane width target for padded feature dims
_SUBLANE = 8         # sublane granularity for the batch (second-to-last) dim
_MAX_BLOCK_B = 512   # batch-tile cap (fits VMEM comfortably on v5e/v6e/v7x)


def _cdiv(a, b):
    return -(-a // b)


def _round_up(x, m):
    return _cdiv(x, m) * m


def _prelu(z, sp, sn):
    # One vmul instead of two: z * select(slope).
    return z * jnp.where(z >= 0, jnp.float32(sp), jnp.float32(sn))


def _pad2(a, rows, cols, dtype):
    a = jnp.asarray(a, dtype)
    return jnp.pad(a, ((0, rows - a.shape[0]), (0, cols - a.shape[1])))


def pack_params(w1, b1, w2, b2, w3, b3):
    """Pre-pack weights/biases ONCE (not per forward call).

    Weights are [in_features, out_features] (PyTorch weight.T) cast to bf16
    with out_features zero-padded to a multiple of 128 so every matmul and the
    output store are lane-dense; biases stay f32 and are added after the f32
    MXU accumulation. The layer-1 contraction dim (input_dim) is left
    unpadded so x never needs a feature-dim pad.
    """
    d, h1 = w1.shape
    h2 = w2.shape[1]
    o = w3.shape[1]
    h1p, h2p, op = (_round_up(v, _LANE) for v in (h1, h2, o))
    return (
        _pad2(w1, d, h1p, jnp.bfloat16),
        _pad2(jnp.reshape(b1, (1, -1)), 1, h1p, jnp.float32),
        _pad2(w2, h1p, h2p, jnp.bfloat16),
        _pad2(jnp.reshape(b2, (1, -1)), 1, h2p, jnp.float32),
        _pad2(w3, h2p, op, jnp.bfloat16),
        _pad2(jnp.reshape(b3, (1, -1)), 1, op, jnp.float32),
    )


def _choose_batch_tiling(b):
    """Return (block_b, n_tiles): block_b % 8 == 0, block_b <= 512, >= 2 grid
    steps whenever the batch allows (v7x two-TensorCore split), and minimal
    dead padded rows for ragged batch sizes."""
    bp8 = _round_up(max(b, 1), _SUBLANE)
    n_tiles = _cdiv(bp8, _MAX_BLOCK_B)
    if n_tiles == 1 and bp8 >= 2 * _SUBLANE:
        n_tiles = 2                      # keep both TensorCores fed on v7x
    block_b = _round_up(_cdiv(bp8, n_tiles), _SUBLANE)
    n_tiles = _cdiv(bp8, block_b)
    return block_b, n_tiles


def mnist_relu_kernel(x_ref, w1_ref, b1_ref, w2_ref, b2_ref, w3_ref, b3_ref,
                      y_ref, *, sp, sn):
    """Fused forward for one batch tile: 3 bf16 matmuls (f32 acc) + 2 PReLU."""
    # In-kernel f32 -> bf16 cast (VPU): avoids a separate padded-copy HBM pass.
    x = x_ref[...].astype(jnp.bfloat16)                 # [block_b, D]

    # Layer 1: input_fc + PReLU
    h1 = jnp.dot(x, w1_ref[...], preferred_element_type=jnp.float32)
    h1 = _prelu(h1 + b1_ref[...], sp, sn).astype(jnp.bfloat16)

    # Layer 2: hidden_fc + PReLU
    h2 = jnp.dot(h1, w2_ref[...], preferred_element_type=jnp.float32)
    h2 = _prelu(h2 + b2_ref[...], sp, sn).astype(jnp.bfloat16)

    # Layer 3: output_fc (no activation)
    y = jnp.dot(h2, w3_ref[...], preferred_element_type=jnp.float32)
    y_ref[...] = (y + b3_ref[...]).astype(y_ref.dtype)


@functools.partial(jax.jit, static_argnames=("out_dim", "sp", "sn"))
def mnist_relu_forward(x, params, *, out_dim, sp=SLOPE_POSITIVE,
                       sn=SLOPE_NEGATIVE):
    """x: [B, input_dim] float32; params: output of pack_params()."""
    w1p, b1p, w2p, b2p, w3p, b3p = params
    b, d = x.shape
    assert w1p.shape[0] == d, "input_dim mismatch between x and packed params"
    h1p, h2p, op = w1p.shape[1], w2p.shape[1], w3p.shape[1]

    block_b, n_tiles = _choose_batch_tiling(b)
    bp = block_b * n_tiles
    if bp != b:
        # Zero rows only; padded rows are sliced off below.
        x = jnp.pad(x, ((0, bp - b), (0, 0)))

    kernel = functools.partial(mnist_relu_kernel, sp=sp, sn=sn)

    yp = pl.pallas_call(
        kernel,
        out_shape=jax.ShapeDtypeStruct((bp, op), jnp.float32),
        grid_spec=pltpu.PrefetchScalarGridSpec(
            num_scalar_prefetch=0,
            grid=(n_tiles,),
            in_specs=[
                pl.BlockSpec((block_b, d), lambda i: (i, 0)),    # x tile (f32)
                pl.BlockSpec((d, h1p), lambda i: (0, 0)),        # W1 (resident)
                pl.BlockSpec((1, h1p), lambda i: (0, 0)),        # b1
                pl.BlockSpec((h1p, h2p), lambda i: (0, 0)),      # W2
                pl.BlockSpec((1, h2p), lambda i: (0, 0)),        # b2
                pl.BlockSpec((h2p, op), lambda i: (0, 0)),       # W3
                pl.BlockSpec((1, op), lambda i: (0, 0)),         # b3
            ],
            out_specs=pl.BlockSpec((block_b, op), lambda i: (i, 0)),
        ),
        compiler_params=pltpu.CompilerParams(
            dimension_semantics=("parallel",),
            vmem_limit_bytes=32 * 1024 * 1024,
        ),
    )(x, w1p, b1p, w2p, b2p, w3p, b3p)

    # Slice padded rows / classes back off (tiny copy; consumers that accept
    # the lane-padded slab can take `yp` directly).
    return yp[:b, :out_dim]


def init_params(key, input_dim, input_width, hidden_width, output_dim,
                cb=0.0, cw=1.0):
    """Deterministic init mirroring MNISTReLU.init_weights(cb, cw):
       weight ~ N(0, cw/in_features), bias ~ N(0, cb)."""
    keys = jax.random.split(key, 6)

    def layer(kw, kb, fan_in, fan_out):
        w = jax.random.normal(kw, (fan_in, fan_out), jnp.float32) \
            * math.sqrt(cw / fan_in)
        b = jax.random.normal(kb, (1, fan_out), jnp.float32) * math.sqrt(cb)
        return w, b

    w1, b1 = layer(keys[0], keys[1], input_dim, input_width)
    w2, b2 = layer(keys[2], keys[3], input_width, hidden_width)
    w3, b3 = layer(keys[4], keys[5], hidden_width, output_dim)
    return w1, b1, w2, b2, w3, b3


def reference_forward(x, w1, b1, w2, b2, w3, b3,
                      sp=SLOPE_POSITIVE, sn=SLOPE_NEGATIVE):
    """Precision-matched reference: bf16 matmul operands, f32 accumulation."""
    bf = jnp.bfloat16

    def dot(a, w):
        return jnp.dot(a.astype(bf), w.astype(bf),
                       preferred_element_type=jnp.float32)

    h1 = _prelu(dot(x, w1) + b1, sp, sn)
    h2 = _prelu(dot(h1, w2) + b2, sp, sn)
    return dot(h2, w3) + b3


if __name__ == "__main__":
    # Small shapes consistent with the module: a flattened-image MLP.
    batch = 16
    input_dim = 64      # flattened input features
    input_width = 32    # first hidden width
    hidden_width = 32   # second hidden width
    output_dim = 16     # number of classes

    key = jax.random.PRNGKey(0)
    kx, kp = jax.random.split(key)
    x = jax.random.normal(kx, (batch, input_dim), jnp.float32)
    raw = init_params(kp, input_dim, input_width, hidden_width, output_dim)

    # Pack (pad + bf16-cast) weights ONCE, outside the forward path.
    params = jax.block_until_ready(pack_params(*raw))

    y = mnist_relu_forward(x, params, out_dim=output_dim)
    y = jax.block_until_ready(y)

    y_ref = reference_forward(x, *raw)
    assert y.shape == (batch, output_dim)
    assert jnp.allclose(y, y_ref, atol=1e-2, rtol=1e-2), "mismatch vs reference"

    print("KERNEL_OK")
</pallas_src>

<mosaic_0001>
module attributes {stable_mosaic.version = 11 : i64} {
  func.func @mnist_relu_kernel(%arg0: i32, %arg1: memref<8x64xf32, #tpu.memory_space<vmem>>, %arg2: memref<64x128xbf16, #tpu.memory_space<vmem>>, %arg3: memref<1x128xf32, #tpu.memory_space<vmem>>, %arg4: memref<128x128xbf16, #tpu.memory_space<vmem>>, %arg5: memref<1x128xf32, #tpu.memory_space<vmem>>, %arg6: memref<128x128xbf16, #tpu.memory_space<vmem>>, %arg7: memref<1x128xf32, #tpu.memory_space<vmem>>, %arg8: memref<8x128xf32, #tpu.memory_space<vmem>>) attributes {dimension_semantics = [#tpu.dimension_semantics<parallel>], iteration_bounds = array<i64: 2>, scalar_prefetch = 0 : i64, scratch_operands = 0 : i64, tpu.core_type = #tpu.core_type<tc>, window_params = [{transform_indices = @transform_0, window_bounds = array<i64: 8, 64>}, {pipeline_mode = #tpu.pipeline_mode<synchronous>, transform_indices = @transform_1, window_bounds = array<i64: 64, 128>}, {pipeline_mode = #tpu.pipeline_mode<synchronous>, transform_indices = @transform_2, window_bounds = array<i64: 1, 128>}, {pipeline_mode = #tpu.pipeline_mode<synchronous>, transform_indices = @transform_3, window_bounds = array<i64: 128, 128>}, {pipeline_mode = #tpu.pipeline_mode<synchronous>, transform_indices = @transform_4, window_bounds = array<i64: 1, 128>}, {pipeline_mode = #tpu.pipeline_mode<synchronous>, transform_indices = @transform_5, window_bounds = array<i64: 128, 128>}, {pipeline_mode = #tpu.pipeline_mode<synchronous>, transform_indices = @transform_6, window_bounds = array<i64: 1, 128>}, {transform_indices = @transform_7, window_bounds = array<i64: 8, 128>}]} {
    %c0 = arith.constant 0 : index
    %c0_0 = arith.constant 0 : index
    %0 = vector.load %arg1[%c0, %c0_0] : memref<8x64xf32, #tpu.memory_space<vmem>>, vector<8x64xf32>
    %1 = arith.truncf %0 : vector<8x64xf32> to vector<8x64xbf16>
    %c0_1 = arith.constant 0 : index
    %c0_2 = arith.constant 0 : index
    %2 = vector.load %arg2[%c0_1, %c0_2] : memref<64x128xbf16, #tpu.memory_space<vmem>>, vector<64x128xbf16>
    %cst = arith.constant dense<0.000000e+00> : vector<8x128xf32>
    %3 = tpu.matmul %1, %2, %cst {dimension_numbers = #tpu.dot_dimension_numbers<[1], [0], [0], [1], [0, 0, 1, 1], [], []>} : vector<8x64xbf16>, vector<64x128xbf16>, vector<8x128xf32> -> vector<8x128xf32>
    %c0_3 = arith.constant 0 : index
    %c0_4 = arith.constant 0 : index
    %4 = vector.load %arg3[%c0_3, %c0_4] : memref<1x128xf32, #tpu.memory_space<vmem>>, vector<1x128xf32>
    %5 = vector.broadcast %4 : vector<1x128xf32> to vector<8x128xf32>
    %6 = arith.addf %3, %5 : vector<8x128xf32>
    %cst_5 = arith.constant 0.000000e+00 : f32
    %7 = vector.broadcast %cst_5 : f32 to vector<8x128xf32>
    %8 = arith.cmpf oge, %6, %7 : vector<8x128xf32>
    %cst_6 = arith.constant 1.000000e+00 : f32
    %cst_7 = arith.constant 2.500000e-01 : f32
    %9 = vector.broadcast %cst_6 : f32 to vector<8x128xf32>
    %10 = vector.broadcast %cst_7 : f32 to vector<8x128xf32>
    %11 = arith.select %8, %9, %10 : vector<8x128xi1>, vector<8x128xf32>
    %12 = arith.mulf %6, %11 : vector<8x128xf32>
    %13 = arith.truncf %12 : vector<8x128xf32> to vector<8x128xbf16>
    %c0_8 = arith.constant 0 : index
    %c0_9 = arith.constant 0 : index
    %14 = vector.load %arg4[%c0_8, %c0_9] : memref<128x128xbf16, #tpu.memory_space<vmem>>, vector<128x128xbf16>
    %cst_10 = arith.constant dense<0.000000e+00> : vector<8x128xf32>
    %15 = tpu.matmul %13, %14, %cst_10 {dimension_numbers = #tpu.dot_dimension_numbers<[1], [0], [0], [1], [0, 0, 1, 1], [], []>} : vector<8x128xbf16>, vector<128x128xbf16>, vector<8x128xf32> -> vector<8x128xf32>
    %c0_11 = arith.constant 0 : index
    %c0_12 = arith.constant 0 : index
    %16 = vector.load %arg5[%c0_11, %c0_12] : memref<1x128xf32, #tpu.memory_space<vmem>>, vector<1x128xf32>
    %17 = vector.broadcast %16 : vector<1x128xf32> to vector<8x128xf32>
    %18 = arith.addf %15, %17 : vector<8x128xf32>
    %cst_13 = arith.constant 0.000000e+00 : f32
    %19 = vector.broadcast %cst_13 : f32 to vector<8x128xf32>
    %20 = arith.cmpf oge, %18, %19 : vector<8x128xf32>
    %cst_14 = arith.constant 1.000000e+00 : f32
    %cst_15 = arith.constant 2.500000e-01 : f32
    %21 = vector.broadcast %cst_14 : f32 to vector<8x128xf32>
    %22 = vector.broadcast %cst_15 : f32 to vector<8x128xf32>
    %23 = arith.select %20, %21, %22 : vector<8x128xi1>, vector<8x128xf32>
    %24 = arith.mulf %18, %23 : vector<8x128xf32>
    %25 = arith.truncf %24 : vector<8x128xf32> to vector<8x128xbf16>
    %c0_16 = arith.constant 0 : index
    %c0_17 = arith.constant 0 : index
    %26 = vector.load %arg6[%c0_16, %c0_17] : memref<128x128xbf16, #tpu.memory_space<vmem>>, vector<128x128xbf16>
    %cst_18 = arith.constant dense<0.000000e+00> : vector<8x128xf32>
    %27 = tpu.matmul %25, %26, %cst_18 {dimension_numbers = #tpu.dot_dimension_numbers<[1], [0], [0], [1], [0, 0, 1, 1], [], []>} : vector<8x128xbf16>, vector<128x128xbf16>, vector<8x128xf32> -> vector<8x128xf32>
    %c0_19 = arith.constant 0 : index
    %c0_20 = arith.constant 0 : index
    %28 = vector.load %arg7[%c0_19, %c0_20] : memref<1x128xf32, #tpu.memory_space<vmem>>, vector<1x128xf32>
    %29 = vector.broadcast %28 : vector<1x128xf32> to vector<8x128xf32>
    %30 = arith.addf %27, %29 : vector<8x128xf32>
    %c0_21 = arith.constant 0 : index
    %c0_22 = arith.constant 0 : index
    %31 = vector.load %arg8[%c0_21, %c0_22] : memref<8x128xf32, #tpu.memory_space<vmem>>, vector<8x128xf32>
    tpu.vector_store %arg8[%c0_21, %c0_22], %30 {strides = array<i32>} : memref<8x128xf32, #tpu.memory_space<vmem>>, vector<8x128xf32>,
    return
  }
  func.func @transform_0(%arg0: i32) -> (i32, i32) {
    %c0_i32 = arith.constant 0 : i32
    %c0_i32_0 = arith.constant 0 : i32
    return %arg0, %c0_i32 : i32, i32
  }
  func.func @transform_1(%arg0: i32) -> (i32, i32) {
    %c0_i32 = arith.constant 0 : i32
    %c0_i32_0 = arith.constant 0 : i32
    %c0_i32_1 = arith.constant 0 : i32
    return %c0_i32, %c0_i32_0 : i32, i32
  }
  func.func @transform_2(%arg0: i32) -> (i32, i32) {
    %c0_i32 = arith.constant 0 : i32
    %c0_i32_0 = arith.constant 0 : i32
    %c0_i32_1 = arith.constant 0 : i32
    return %c0_i32, %c0_i32_0 : i32, i32
  }
  func.func @transform_3(%arg0: i32) -> (i32, i32) {
    %c0_i32 = arith.constant 0 : i32
    %c0_i32_0 = arith.constant 0 : i32
    %c0_i32_1 = arith.constant 0 : i32
    return %c0_i32, %c0_i32_0 : i32, i32
  }
  func.func @transform_4(%arg0: i32) -> (i32, i32) {
    %c0_i32 = arith.constant 0 : i32
    %c0_i32_0 = arith.constant 0 : i32
    %c0_i32_1 = arith.constant 0 : i32
    return %c0_i32, %c0_i32_0 : i32, i32
  }
  func.func @transform_5(%arg0: i32) -> (i32, i32) {
    %c0_i32 = arith.constant 0 : i32
    %c0_i32_0 = arith.constant 0 : i32
    %c0_i32_1 = arith.constant 0 : i32
    return %c0_i32, %c0_i32_0 : i32, i32
  }
  func.func @transform_6(%arg0: i32) -> (i32, i32) {
    %c0_i32 = arith.constant 0 : i32
    %c0_i32_0 = arith.constant 0 : i32
    %c0_i32_1 = arith.constant 0 : i32
    return %c0_i32, %c0_i32_0 : i32, i32
  }
  func.func @transform_7(%arg0: i32) -> (i32, i32) {
    %c0_i32 = arith.constant 0 : i32
    %c0_i32_0 = arith.constant 0 : i32
    return %arg0, %c0_i32 : i32, i32
  }
}

</mosaic_0001>

<bundles_post_ra>
// kernel: mnist_relu_forward.1
= control target key start
LH: loop header
LB: loop body
LE: loop exit
PB: predicated region body
PF: predicated region fallthrough
CT: control target
= control target key end

     0   :  { %s1445_s0 = inlined_call_operand.hbm [shape: f32[16,64], index: 0, kind: input, shape index: {}]   ;;  %s1446_s1 = inlined_call_operand.hbm [shape: bf16[64,128], index: 1, kind: input, shape index: {}]   ;;  %s1447_s2 = inlined_call_operand.vmem [shape: f32[1,128], index: 2, kind: input, shape index: {}]   ;;  %s1448_s3 = inlined_call_operand.hbm [shape: bf16[128,128], index: 3, kind: input, shape index: {}]   ;;  %s1449_s4 = inlined_call_operand.vmem [shape: f32[1,128], index: 4, kind: input, shape index: {}]   ;;  %s1450_s5 = inlined_call_operand.hbm [shape: bf16[128,128], index: 5, kind: input, shape index: {}]   ;;  %s1451_s6 = inlined_call_operand.vmem [shape: f32[1,128], index: 6, kind: input, shape index: {}]   ;;  %s1452_s7 = inlined_call_operand.hbm [shape: f32[16,128], index: 7, kind: output, shape index: {}]  }
   0x1   :  { %1457 = sst [smem:[#allocation15_spill]] %s1446_s1 }
   0x2   :  { %1458 = sst [smem:[#allocation16_spill]] %s1448_s3 }
   0x3   :  { %12 = vsyncpa [#allocation3], 0 }
   0x4   :  { %14 = vsyncpa [#allocation3 + $0x1], 0 }
   0x5   :  { %15 = vsyncpa [#allocation6], 0 }
   0x6   :  { %16 = vsyncpa [#allocation9], 0 }
   0x7   :  { %17 = vsyncpa [#allocation4], 0 }
   0x8   :  { %19 = vsyncpa [#allocation4 + $0x1], 0  ;;  %s1217_s24 = smov 0   ;;  %s1219_s25 = smov 0  }
   0x9   :  { %s1221_s26 = smov 0   ;;  %s1223_s27 = smov 0  }
   0xa LB: > { %s1238_s28 = sadd.s32 4294967295, %s1165_s27   ;;  %s768_s29 = sadd.s32 4294967294, %s1165_s27   ;;  %s1165_s27 = sphi %s1223_s27, %s1480_s27   ;;  %s1161_s26 = sphi %s1221_s26, %s1479_s26   ;;  %s1157_s25 = sphi %s1219_s25, %s1478_s25   ;;  %s1153_s24 = sphi %s1217_s24, %s1477_s24  }
   0xb   : > { %p45_p0 = scmp.ne.s32.totalorder %s1157_s25, %s1153_s24  ;;  %p1453_p1 = scmp.eq.s32.totalorder %s1238_s28, 0 }
   0xc   : > { %p201_p3 = scmp.eq.s32.totalorder %s768_s29, 1  ;;  %p769_p5 = scmp.ge.s32.totalorder %s1165_s27, 1 }
   0xd   : > { %p1247_p4 = por %p1453_p1, %p45_p0  ;;  %p208_p7 = scmp.lt.s32.totalorder %s1165_s27, 3 }
   0xe   : > { %p1252_p6 = por %p201_p3, %p45_p0  ;;  %s1167_s10 = smov [#allocation5]  }
   0xf   : > { %s1459_s30 = scalar_select %p1247_p4, 1, 0 }
  0x10   : > { %s1460_s8 = scalar_select %p1252_p6, 1, 0 }
  0x11   : > { %p1257_p8 = pnand %p769_p5, %p208_p7  ;;  %s220_s11 = sshll.u32 %s1167_s10, 4  ;;  %s221_s11 = int_to_ptr.vmem [resolvable:$true] %s220_s11 }
  0x12   : > { %s1168_s13 = smov [#allocation7]   ;;  %s1169_s15 = smov [#allocation8]  }
  0x13   : > { %s1461_s9 = scalar_select %p1257_p8, 1, 0 }
  0x14   : > { %p901_p9 = pneg %p1257_p8  ;;  %s236_s14 = sshll.u32 %s1168_s13, 4  ;;  %s237_s14 = int_to_ptr.vmem [resolvable:$true] %s236_s14 }
  0x15   : > { %s252_s16 = sshll.u32 %s1169_s15, 4  ;;  %s998_s17 = scalar_lea.vmem %s221_s11, 512  ;;  %s253_s16 = int_to_ptr.vmem [resolvable:$true] %s252_s16 }
  0x16   : > { %p1266_p11 = pnand %p901_p9, %p1453_p1  ;;  %p999_p13 = scmp.ne.s32.totalorder %s221_s11, %s998_s17 }
  0x17   : > { %p1006_p5 = scmp.lt.s32.totalorder %s221_s11, %s221_s11  ;;  %p1007_p7 = scmp.lt.s32.totalorder %s998_s17, %s998_s17 }
  0x18   : > { %p989_p12 = pneg %p1266_p11 }
  0x19   : > { %p1008_p9 = por %p1007_p7, %p1006_p5 }
  0x1a   : > { %p1001_p0 = pnand %p999_p13, %p989_p12 }
  0x1c   : > { %p1002_p3 = pneg %p1001_p0 }
  0x1e   : > { %p1009_p10 = pnand %p1008_p9, %p1002_p3 }
  0x20   : > { %1012 = shalt.err (!%p1009_p10)
}
  0x21   : > { %s1170_s18 = smov 64   ;;  %s1171_s19 = smov 4  }
  0x22   : > { %s1463_s1 = sld [smem:[#allocation15_spill]]  ;;  %s1024_s22 = scalar_lea.vmem %s237_s14, 1024 }
  0x23   : > { %p1025_p1 = scmp.ne.s32.totalorder %s237_s14, %s1024_s22  ;;  %p1032_p2 = scmp.lt.s32.totalorder %s237_s14, %s237_s14 }
  0x24   : > { %p1033_p6 = scmp.lt.s32.totalorder %s1024_s22, %s1024_s22 }
  0x25   : > { %p1027_p13 = pnand %p1025_p1, %p989_p12 }
  0x26   : > { %p1034_p5 = por %p1033_p6, %p1032_p2 }
  0x27   : > { %p1028_p0 = pneg %p1027_p13 }
  0x28   : > { %904 = dma.hbm_to_vmem [thread:$0]  (!%p1266_p11), %s1463_s1, 512, %s221_s11, [#allocation6], %s1170_s18, %s1170_s18, %s1171_s19  }
  0x29   : > { %p1035_p3 = pnand %p1034_p5, %p1028_p0 }
  0x2b   : > { %1038 = shalt.err (!%p1035_p3)
}
  0x2c   : > { %s1464_s3 = sld [smem:[#allocation16_spill]]  ;;  %s1050_s10 = scalar_lea.vmem %s253_s16, 1024 }
  0x2d   : > { %p1051_p10 = scmp.ne.s32.totalorder %s253_s16, %s1050_s10  ;;  %p1058_p9 = scmp.lt.s32.totalorder %s253_s16, %s253_s16 }
  0x2e   : > { %p1059_p13 = scmp.lt.s32.totalorder %s1050_s10, %s1050_s10 }
  0x2f   : > { %p1053_p7 = pnand %p1051_p10, %p989_p12 }
  0x30   : > { %p1060_p4 = por %p1059_p13, %p1058_p9 }
  0x31   : > { %p1054_p1 = pneg %p1053_p7 }
  0x32   : > { %907 = dma.hbm_to_vmem [thread:$0]  (!%p1266_p11), %s1464_s3, 1024, %s237_s14, [#allocation6], %s1170_s18, %s1170_s18, %s1171_s19  }
  0x33   : > { %p1061_p2 = pnand %p1060_p4, %p1054_p1 }
  0x35   : > { %1064 = shalt.err (!%p1061_p2)
}
  0x36   : > { %910 = dma.hbm_to_vmem [thread:$0]  (!%p1266_p11), %s1450_s5, 1024, %s253_s16, [#allocation9], %s1170_s18, %s1170_s18, %s1171_s19  }
  0x37   : > { %s1297_s14 = sadd.s32 1, %s1165_s27   ;;  %s32_s12 = sadd.s32 1, %s1161_s26 }
  0x38   : > { %s29_s15 = ssub.s32 %s1165_s27, %s1297_s14  ;;  %p39_p6 = scmp.ne.s32.totalorder %s1161_s26, %s1157_s25 }
  0x39   : > { %p30_p4 = scmp.eq.s32.totalorder %s29_s15, 0  ;;  %p40_p12 = scmp.eq.s32.totalorder %s1165_s27, 0 }
  0x3a   : > { %p922_p0 = scmp.lt.s32.totalorder %s1165_s27, 2  ;;  %p1465_p3 = scmp.eq.s32.totalorder %s1238_s28, 1 }
  0x3b   : > { %s1307_s17 = scalar_select %p30_p4, %s1161_s26, %s32_s12  }
  0x3c   : > { %p41_p5 = por %p40_p12, %p39_p6  ;;  %p1311_p10 = por %p1465_p3, %p39_p6 }
  0x3d   : > { %s269_s21 = sand.u32 1, %s1161_s26   ;;  %s775_s22 = sshll.u32 %s1165_s27, 7 }
  0x3e   : > { %s1466_s20 = scalar_select %p1311_p10, 1, 0 }
  0x3f   : > { %s774_s16 = sshll.u32 %s269_s21, 3  ;;  %s1320_s23 = scalar_lea.hbm %s1445_s0, %s775_s22 }
  0x40   : > { %s273_s29 = scalar_lea.vmem [#allocation2], %s774_s16  ;;  %p1322_p11 = pnand %p922_p0, %p41_p5 }
  0x41   : > { %s280_s10 = sshll.u32 %s273_s29, 4  ;;  %s270_s13 = scalar_lea.sflag [#allocation3], %s269_s21  ;;  %s281_s10 = int_to_ptr.vmem [resolvable:$true] %s280_s10 }
  0x42   : > { %s1065_s15 = scalar_lea.hbm %s1320_s23, 128  ;;  %p1067_p1 = pneg %p1322_p11 }
  0x43   : > { %p1066_p7 = scmp.ne.s32.totalorder %s1320_s23, %s1065_s15  ;;  %s1070_s18 = scalar_lea.hbm %s1445_s0, 256 }
  0x44   : > { %p1071_p2 = scmp.lt.s32.totalorder %s1320_s23, %s1445_s0  ;;  %p1072_p4 = scmp.lt.s32.totalorder %s1070_s18, %s1065_s15 }
  0x45   : > { %p1068_p9 = pnand %p1067_p1, %p1066_p7 }
  0x46   : > { %p1073_p6 = por %p1072_p4, %p1071_p2 }
  0x47   : > { %p1069_p13 = pneg %p1068_p9 }
  0x49   : > { %p1074_p12 = pnand %p1073_p6, %p1069_p13 }
  0x4b   : > { %1077 = shalt.err (!%p1074_p12)
}
  0x4c   : > { %s1078_s29 = scalar_lea.vmem %s281_s10, 128  ;;  %s1172_s21 = smov [#allocation2]  }
  0x4d   : > { %p1079_p0 = scmp.ne.s32.totalorder %s281_s10, %s1078_s29  ;;  %s1083_s1 = sshll.u32 %s1172_s21, 4  ;;  %s1084_s1 = int_to_ptr.vmem [resolvable:$false] %s1083_s1 }
  0x4e   : > { %s1085_s3 = scalar_lea.vmem %s1084_s1, 256  ;;  %p1086_p7 = scmp.lt.s32.totalorder %s281_s10, %s1084_s1 }
  0x4f   : > { %p1081_p5 = pnand %p1079_p0, %p1067_p1  ;;  %p1087_p9 = scmp.lt.s32.totalorder %s1085_s3, %s1078_s29 }
  0x51   : > { %p1082_p3 = pneg %p1081_p5  ;;  %p1088_p10 = por %p1087_p9, %p1086_p7 }
  0x53   : > { %p1089_p8 = pnand %p1088_p10, %p1082_p3 }
  0x55   : > { %1092 = shalt.err (!%p1089_p8)
}
  0x56   : > { %914 = dma.hbm_to_vmem [thread:$0]  (!%p1322_p11), %s1320_s23, 128, %s281_s10, %s270_s13  }
  0x57   : > { %p1468_p13 = scmp.ne.s32.totalorder %s1461_s9, 0 }
  0x58   : > { %s1343_s15 = sand.u32 (!%p1468_p13), 1, %s1157_s25   ;;  %p1469_p10 = scmp.ne.s32.totalorder (!%p1468_p13), %s1459_s30, 0 }
  0x59   : > { %289 = sbr.rel (%p1468_p13) target bundleno = 730 (0x2da), region = 48  ;;  %s777_s12 = sshll.u32 (!%p1468_p13), %s1343_s15, 3 }
  0x5a   : > { %s292_s1 = scalar_lea.sflag (!%p1468_p13), [#allocation3], %s1343_s15  ;;  %s295_s3 = scalar_lea.vmem (!%p1468_p13), [#allocation2], %s777_s12 }
  0x5e   : > { %1136 = dma.done.wait (%p1469_p10), %s292_s1, 128  }
  0x5f   : > { %1138 = vsyncadd (%p1469_p10), %s292_s1, 4294967168  ;;  %p1470_p8 = scmp.eq.s32.totalorder %s1238_s28, 0 }
  0x61   : > { %1140 = dma.done.wait (%p1470_p8), [#allocation6], 1536   ;;  %p1471_p11 = pmov %p1470_p8 }
  0x62   : > { %p1472_p1 = pmov %p1470_p8 }
  0x63   : > { %1142 = vsyncadd (%p1471_p11), [#allocation6], 4294965760 }
  0x64   : > { %1144 = dma.done.wait (%p1472_p1), [#allocation9], 1024   ;;  %p1473_p2 = pmov %p1472_p1 }
  0x65   : > { %v1173_v0 = vmov 0.0   ;;  %vm1174_vm0 = vmmov 0   ;;  %v967_v1 = vld [vmem:[#allocation5 + $0x18] sm:$0xff]   ;;  %v968_v2 = vld [vmem:[#allocation5 + $0x10] sm:$0xff]   ;;  %v969_v4 = vld [vmem:[#allocation5 + $0x8] sm:$0xff]   ;;  %vm380_vm1 = vcmask 523264  }
  0x66   : > { %1146 = vsyncadd (%p1473_p2), [#allocation9], 4294966272  ;;  %833 = vmatprep.subr.bf16.mxu0 %v1173_v0  ;;  %841 = vmatprep.mubr.msk.bf16.mxu0 %vm1174_vm0, %v1173_v0  ;;  %v971_v3 = vld [vmem:[#allocation7 + $0x38] sm:$0xff]   ;;  %v972_v5 = vld [vmem:[#allocation7 + $0x30] sm:$0xff]   ;;  %v1175_v25 = vmov 0.25   ;;  %s807_s22 = sshll.u32 %s1238_s28, 7 }
  0x67   : > { %845 = vmatprep.subr.bf16.mxu1 %v1173_v0  ;;  %861 = vmatprep.mubr.msk.bf16.mxu1 %vm1174_vm0, %v1173_v0  ;;  %v970_v6 = vld [vmem:[#allocation5] sm:$0xff]   ;;  %v339_v7 = vld [vmem:[%s295_s3] sm:$0xff]  ;;  %v973_v8 = vld [vmem:[#allocation7 + $0x28] sm:$0xff]   ;;  %s337_s18 = scalar_lea.vmem [#allocation10], %s777_s12  ;;  %s1402_s21 = scalar_lea.hbm %s1452_s7, %s807_s22 }
  0x68   : > { %834 = vmatpush3.bf16.msra.mxu0 %v967_v1  ;;  %846 = vmatpush3.bf16.msra.mxu1 %v971_v3  ;;  %v340_v9 = vpack.c.bf16 %v339_v7, %v339_v7  ;;  %v974_v10 = vld [vmem:[#allocation7 + $0x20] sm:$0xff]   ;;  %v975_v11 = vld [vmem:[#allocation7 + $0x18] sm:$0xff]   ;;  %v976_v12 = vld [vmem:[#allocation7 + $0x10] sm:$0xff]   ;;  %s669_s19 = sshll.u32 %s337_s18, 4  ;;  %s656_s1 = scalar_lea.sflag [#allocation4], %s1343_s15  ;;  %s1404_s19 = int_to_ptr.vmem [resolvable:$true] %s669_s19 }
  0x69   : > { %835 = vmatprep.subr.bf16.mxu0 %v1173_v0  ;;  %847 = vmatprep.subr.bf16.mxu1 %v1173_v0  ;;  %v977_v13 = vld [vmem:[#allocation7 + $0x8] sm:$0xff]   ;;  %v978_v14 = vld [vmem:[#allocation7] sm:$0xff]   ;;  %v979_v15 = vld [vmem:[#allocation8 + $0x38] sm:$0xff]   ;;  %s1093_s28 = scalar_lea.vmem %s1404_s19, 128  ;;  %p1474_p6 = scmp.ne.s32.totalorder %s1466_s20, 0 }
  0x6a   : > { %v980_v16 = vld [vmem:[#allocation8 + $0x30] sm:$0xff]   ;;  %v981_v17 = vld [vmem:[#allocation8 + $0x28] sm:$0xff]   ;;  %v982_v18 = vld [vmem:[#allocation8 + $0x20] sm:$0xff]   ;;  %p1094_p4 = scmp.ne.s32.totalorder %s1404_s19, %s1093_s28  ;;  %s1176_s12 = smov [#allocation10]  }
  0x6b   : > { %v983_v19 = vld [vmem:[#allocation8 + $0x18] sm:$0xff]   ;;  %v984_v20 = vld [vmem:[#allocation8 + $0x10] sm:$0xff]   ;;  %v985_v31 = vld [vmem:[#allocation8 + $0x8] sm:$0xff]   ;;  %s1097_s3 = sshll.u32 %s1176_s12, 4  ;;  %s1098_s3 = int_to_ptr.vmem [resolvable:$false] %s1097_s3 }
  0x6c   : > { %836 = vmatpush3.bf16.msra.mxu0 %v968_v2  ;;  %848 = vmatpush3.bf16.msra.mxu1 %v972_v5  ;;  %v782_v21 = vld [vmem:[%s1447_s2] ss:$0 sm:$0xff]  ;;  %v986_v32 = vld [vmem:[#allocation8] sm:$0xff]   ;;  %p1095_p12 = pnand %p1094_p4, %p1474_p6  ;;  %s1099_s30 = scalar_lea.vmem %s1098_s3, 256 }
  0x6d   : > { %837 = vmatprep.subr.bf16.mxu0 %v1173_v0  ;;  %849 = vmatprep.subr.bf16.mxu1 %v1173_v0  ;;  %v788_v33 = vld [vmem:[%s1449_s4] ss:$0 sm:$0xff]  ;;  %p1100_p5 = scmp.lt.s32.totalorder %s1404_s19, %s1098_s3  ;;  %p1101_p3 = scmp.lt.s32.totalorder %s1099_s30, %s1093_s28 }
  0x6e   : > { %v797_v42 = vld [vmem:[%s1451_s6] ss:$0 sm:$0xff]  ;;  %p1096_p0 = pneg %p1095_p12 }
  0x6f   : > { %p1102_p7 = por %p1101_p3, %p1100_p5 }
  0x70   : > { %838 = vmatpush3.bf16.msra.mxu0 %v969_v4  ;;  %850 = vmatpush3.bf16.msra.mxu1 %v973_v8 }
  0x71   : > { %839 = vmatprep.subr.bf16.mxu0 %v1173_v0  ;;  %851 = vmatprep.subr.bf16.mxu1 %v1173_v0  ;;  %p1103_p9 = pnand %p1102_p7, %p1096_p0 }
  0x74   : > { %840 = vmatpush3.bf16.msra.mxu0 %v970_v6  ;;  %852 = vmatpush3.bf16.msra.mxu1 %v974_v10 }
  0x75   : > { %865 = vmatprep.subr.bf16.mxu0 %v1173_v0  ;;  %853 = vmatprep.subr.bf16.mxu1 %v1173_v0 }
  0x77   : > { %842 = vmatmul.mubr.msk.bf16.vlgmr.msra.gmra.mxu0 %vm380_vm1, %v340_v9 }
  0x78   : > { %881 = vmatprep.mubr.msk.bf16.mxu0 %vm1174_vm0, %v1173_v0  ;;  %854 = vmatpush3.bf16.msra.mxu1 %v975_v11 }
  0x79   : > { %855 = vmatprep.subr.bf16.mxu1 %v1173_v0  ;;  %866 = vmatpush3.bf16.msra.mxu0 %v979_v15 }
  0x7a   : > { %867 = vmatprep.subr.bf16.mxu0 %v1173_v0 }
  0x7c   : > { %856 = vmatpush3.bf16.msra.mxu1 %v976_v12 }
  0x7d   : > { %857 = vmatprep.subr.bf16.mxu1 %v1173_v0  ;;  %868 = vmatpush3.bf16.msra.mxu0 %v980_v16 }
  0x7e   : > { %869 = vmatprep.subr.bf16.mxu0 %v1173_v0 }
  0x80   : > { %858 = vmatpush3.bf16.msra.mxu1 %v977_v13 }
  0x81   : > { %859 = vmatprep.subr.bf16.mxu1 %v1173_v0  ;;  %870 = vmatpush3.bf16.msra.mxu0 %v981_v17 }
  0x82   : > { %871 = vmatprep.subr.bf16.mxu0 %v1173_v0 }
  0x84   : > { %860 = vmatpush3.bf16.msra.mxu1 %v978_v14 }
  0x85   : > { %872 = vmatpush3.bf16.msra.mxu0 %v982_v18 }
  0x86   : > { %873 = vmatprep.subr.bf16.mxu0 %v1173_v0 }
  0x89   : > { %874 = vmatpush3.bf16.msra.mxu0 %v983_v19 }
  0x8a   : > { %875 = vmatprep.subr.bf16.mxu0 %v1173_v0 }
  0x8d   : > { %876 = vmatpush3.bf16.msra.mxu0 %v984_v20 }
  0x8e   : > { %877 = vmatprep.subr.bf16.mxu0 %v1173_v0 }
  0x91   : > { %878 = vmatpush3.bf16.msra.mxu0 %v985_v31 }
  0x92   : > { %879 = vmatprep.subr.bf16.mxu0 %v1173_v0 }
  0x95   : > { %880 = vmatpush3.bf16.msra.mxu0 %v986_v32 }
 0x137   : > { %v418_v22 = vpop.f32.mrf.mxu0 }
 0x138   : > { %v419_v23 = vadd.f32 %v782_v21, %v418_v22 }
 0x139   : > { %v843_v24 = vpop.f32.mrf.mxu0 }
 0x13a   : > { %vm424_vm2 = vcmp.ge.f32.partialorder %v419_v23, 0.0 }
 0x13b   : > { %v425_v26 = vsel %vm424_vm2, 1.0, %v1175_v25  ;;  %v421_v27 = vpop.f32.mrf.mxu0 }
 0x13c   : > { %v426_v28 = vmul.f32 %v425_v26, %v419_v23 }
 0x13d   : > { %v844_v29 = vpop.f32.mrf.mxu0 }
 0x13e   : > { %v427_v30 = vpack.c.bf16 %v426_v28, %v426_v28 }
 0x140   : > { %862 = vmatmul.mubr.bf16.vlgmr.msra.gmra.mxu1 %v427_v30 }
 0x200   : > { %v533_v34 = vpop.f32.mrf.mxu1 }
 0x201   : > { %v534_v35 = vadd.f32 %v788_v33, %v533_v34 }
 0x202   : > { %v863_v36 = vpop.f32.mrf.mxu1 }
 0x203   : > { %vm539_vm3 = vcmp.ge.f32.partialorder %v534_v35, 0.0 }
 0x204   : > { %v540_v37 = vsel %vm539_vm3, 1.0, %v1175_v25  ;;  %v536_v38 = vpop.f32.mrf.mxu1 }
 0x205   : > { %v541_v39 = vmul.f32 %v540_v37, %v534_v35 }
 0x206   : > { %v864_v40 = vpop.f32.mrf.mxu1 }
 0x207   : > { %v542_v41 = vpack.c.bf16 %v541_v39, %v541_v39 }
 0x209   : > { %882 = vmatmul.mubr.bf16.vlgmr.msra.gmra.mxu0 %v542_v41 }
 0x2c9   : > { %v648_v43 = vpop.f32.mrf.mxu0 }
 0x2ca   : > { %v649_v44 = vadd.f32 %v797_v42, %v648_v43 }
 0x2cb   : > { %v883_v45 = vpop.f32.mrf.mxu0 }
 0x2cc   : > { %654 = vst [vmem:[%s337_s18] sm:$0xff] %v649_v44 }
 0x2cd   : > { %v651_v46 = vpop.f32.mrf.mxu0 }
 0x2ce   : > { %1106 = shalt.err (!%p1103_p9)
}
 0x2cf   : > { %s1107_s9 = scalar_lea.hbm %s1402_s21, 128  ;;  %s1111_s10 = scalar_lea.hbm %s1452_s7, 256 }
 0x2d0   : > { %p1108_p13 = scmp.ne.s32.totalorder %s1402_s21, %s1107_s9  ;;  %p1112_p11 = scmp.lt.s32.totalorder %s1402_s21, %s1452_s7 }
 0x2d1   : > { %p1113_p1 = scmp.lt.s32.totalorder %s1111_s10, %s1107_s9 }
 0x2d2   : > { %p1109_p10 = pnand %p1108_p13, %p1474_p6 }
 0x2d3   : > { %p1114_p2 = por %p1113_p1, %p1112_p11 }
 0x2d4   : > { %p1110_p8 = pneg %p1109_p10 }
 0x2d6   : > { %p1115_p4 = pnand %p1114_p2, %p1110_p8 }
 0x2d8   : > { %1118 = shalt.err (!%p1115_p4)
}
 0x2d9   : > { %899 = dma.vmem_to_hbm [thread:$0]  (%p1474_p6), %s1404_s19, 128, %s1402_s21, %s656_s1   ;;  %v884_v47 = vpop.f32.mrf.mxu0 }
 0x2da PF: > { %s681_s22 = sand.u32 1, %s1153_s24   ;;  %p1475_p12 = scmp.ne.s32.totalorder %s1460_s8, 0 }
 0x2db   : > { %p1476_p0 = scmp.ge.s32.totalorder %s1165_s27, 2  ;;  %s682_s18 = scalar_lea.sflag [#allocation4], %s681_s22 }
 0x2dd   : > { %p916_p5 = pnand %p1476_p0, %p1475_p12 }
 0x2df   : > { %p917_p3 = pneg %p916_p5 }
 0x2e1   : > { %1148 = dma.done.wait (%p917_p3), %s682_s18, 128  }
 0x2e2   : > { %1150 = vsyncadd (%p917_p3), %s682_s18, 4294967168  ;;  %p22_p7 = scmp.ge.s32.totalorder %s1297_s14, 4   ;;  %s1477_s24 = smov %s1157_s25 }
 0x2e3   : > { %s1478_s25 = smov %s1161_s26  ;;  %s1479_s26 = smov %s1307_s17 }
 0x2e4   : > { %s1480_s27 = smov %s1297_s14  ;;  %24 = sbr.rel (!%p22_p7) target bundleno = 10 (0xa), region = 105 }
 0x2e9   :  { %687 = vsyncpa [#allocation3], 1 }
 0x2ea   :  { %689 = vsyncpa [#allocation3 + $0x1], 1 }
 0x2eb   :  { %690 = vsyncpa [#allocation6], 1 }
 0x2ec   :  { %691 = vsyncpa [#allocation9], 1 }
 0x2ed   :  { %692 = vsyncpa [#allocation4], 1 }
 0x2ee   :  { %694 = vsyncpa [#allocation4 + $0x1], 1 }

</bundles_post_ra>
